<compile_context>
chip_gen: v6e
topology: v6e:2x2x1
jax: 0.10.0
libtpu: 0.0.40
codegen_flags: <defaults>
</compile_context>

<pallas_src>
import functools

import jax
import jax.numpy as jnp
from jax import lax
from jax.experimental import pallas as pl
from jax.experimental.pallas import tpu as pltpu

LANE = 128
MAX_BLOCK_ROWS = 4096   # (4096, 128) f32 block = 2 MiB; x2 double-buffer = 4 MiB
ACC_ROWS = 8            # accumulator = one f32 vreg tile (8, 128)


def _round_down(x, m):
    return (x // m) * m


def _hardshrink_loss_kernel(x_ref, out_ref, acc_ref, *,
                            lowbound, upbound, total_rows, block_rows,
                            inner_steps):
    """Accumulate sum of (x * passcond)^2 for one core-chunk of the slab.

    x_ref:   (block_rows, LANE) VMEM tile of the flattened input (orig dtype)
    out_ref: (1, 1) SMEM per-chunk partial sum
    acc_ref: (ACC_ROWS, LANE) f32 VMEM accumulator, persists across grid steps
    """
    c = pl.program_id(0)   # core-split axis ("parallel")
    j = pl.program_id(1)   # sequential reduction axis ("arbitrary")

    @pl.when(j == 0)
    def _init():
        acc_ref[...] = jnp.zeros_like(acc_ref)

    x = x_ref[...].astype(jnp.float32)              # upcast in-kernel only

    # Mask rows beyond the real extent (ragged last block reads unspecified
    # data) -- one compare+select per vreg, free under the DMA.
    block_idx = c * inner_steps + j
    row_ids = block_idx * block_rows + lax.broadcasted_iota(jnp.int32, x.shape, 0)
    passcond = (x > upbound) | (x < lowbound)
    px = jnp.where(passcond & (row_ids < total_rows), x, 0.0)
    sq = px * px

    # Partial reduce over the leading (vreg-stack) axis only: pure VPU adds
    # into the resident (8, 128) accumulator. No per-step XLU / scalar chain.
    acc_ref[...] += jnp.sum(
        sq.reshape(block_rows // ACC_ROWS, ACC_ROWS, LANE), axis=0
    )

    @pl.when(j == pl.num_programs(1) - 1)
    def _finalize():
        # single full cross-lane/cross-sublane reduce per core-chunk
        out_ref[0, 0] = jnp.sum(acc_ref[...])


def hardshrink_loss(x, lowbound, upbound):
    """Pallas implementation of HardshinkLoss.forward. Returns a scalar."""
    orig_dtype = x.dtype
    n_elems = x.size
    lowbound = float(lowbound)
    upbound = float(upbound)

    flat = x.reshape(-1)                     # keep original dtype; no HBM copy
    rows = n_elems // LANE
    rem = n_elems - rows * LANE

    # ragged < LANE remainder (rare): handled in plain JAX, at most 127 elems.
    tail_sum = jnp.float32(0.0)
    if rem:
        tail = flat[rows * LANE:].astype(jnp.float32)
        tp = jnp.where((tail > upbound) | (tail < lowbound), tail, 0.0)
        tail_sum = jnp.sum(tp * tp)

    if rows == 0:
        # Tiny input (< 128 elems): nothing for the kernel to do.
        total = tail_sum
    else:
        x2d_src = flat[: rows * LANE] if rem else flat
        x2d = x2d_src.reshape(rows, LANE)

        # Biggest block that (a) stays a multiple of 8 rows and (b) fits the
        # conservative VMEM budget on every generation (v5e 16 MiB scoped,
        # v7x 64 MiB physical).
        if rows >= ACC_ROWS:
            block_rows = min(MAX_BLOCK_ROWS, _round_down(rows, ACC_ROWS))
        else:
            block_rows = ACC_ROWS
        n_blocks = pl.cdiv(rows, block_rows)

        # Split the scan across 2 TensorCores when the block count allows an
        # even split (up to ~2x on v7x; harmless on single-TC v5e/v6e).
        nsplit = 2 if (n_blocks >= 2 and n_blocks % 2 == 0) else 1
        inner_steps = n_blocks // nsplit

        kernel = functools.partial(
            _hardshrink_loss_kernel,
            lowbound=lowbound,
            upbound=upbound,
            total_rows=rows,
            block_rows=block_rows,
            inner_steps=inner_steps,
        )

        partials = pl.pallas_call(
            kernel,
            out_shape=jax.ShapeDtypeStruct((nsplit, 1), jnp.float32),
            grid_spec=pltpu.PrefetchScalarGridSpec(
                num_scalar_prefetch=0,
                grid=(nsplit, inner_steps),
                in_specs=[
                    pl.BlockSpec(
                        (block_rows, LANE),
                        lambda c, j: (c * inner_steps + j, 0),
                    )
                ],
                out_specs=pl.BlockSpec(
                    (1, 1), lambda c, j: (c, 0), memory_space=pltpu.SMEM
                ),
                scratch_shapes=[pltpu.VMEM((ACC_ROWS, LANE), jnp.float32)],
            ),
            compiler_params=pltpu.CompilerParams(
                dimension_semantics=("parallel", "arbitrary")
            ),
        )(x2d)

        total = jnp.sum(partials) + tail_sum

    # mean over the ORIGINAL element count (masked / tail elements contribute 0)
    loss = total / jnp.float32(n_elems)
    return loss.astype(orig_dtype)


class HardshinkLoss:
    """JAX/Pallas counterpart of the PyTorch module (no parameters)."""

    def __init__(self, lowbound, upbound):
        self.lowbound = lowbound
        self.upbound = upbound

    def __call__(self, x):
        return hardshrink_loss(x, self.lowbound, self.upbound)


if __name__ == "__main__":
    key = jax.random.PRNGKey(0)
    # NCHW-shaped input, as the PyTorch module would receive.
    x = jax.random.normal(key, (2, 4, 16, 16), dtype=jnp.float32)

    lowbound, upbound = -0.5, 0.5
    mod = HardshinkLoss(lowbound, upbound)

    loss = mod(x)
    loss = jax.block_until_ready(loss)

    # reference check in plain JAX
    passcond = (x > upbound) | (x < lowbound)
    ref = jnp.mean((x * passcond.astype(x.dtype)) ** 2)
    assert jnp.allclose(loss, ref, rtol=1e-5, atol=1e-6), (loss, ref)

    print("KERNEL_OK")
</pallas_src>

<mosaic_0001>
module attributes {stable_mosaic.version = 11 : i64} {
  func.func @_hardshrink_loss_kernel(%arg0: i32, %arg1: i32, %arg2: memref<16x128xf32, #tpu.memory_space<vmem>>, %arg3: memref<1x1xf32, #tpu.memory_space<smem>>, %arg4: memref<8x128xf32, #tpu.memory_space<vmem>>) attributes {dimension_semantics = [#tpu.dimension_semantics<parallel>, #tpu.dimension_semantics<arbitrary>], iteration_bounds = array<i64: 1, 1>, scalar_prefetch = 0 : i64, scratch_operands = 1 : i64, tpu.core_type = #tpu.core_type<tc>, window_params = [{transform_indices = @transform_0, window_bounds = array<i64: 16, 128>}, {transform_indices = @transform_1, window_bounds = array<i64: 1, 1>}]} {
    %c0_i32 = arith.constant 0 : i32
    %0 = arith.cmpi eq, %arg1, %c0_i32 : i32
    %1 = arith.extui %0 : i1 to i32
    %c0_i32_0 = arith.constant 0 : i32
    %2 = arith.cmpi ne, %1, %c0_i32_0 : i32
    scf.if %2 {
      %cst_12 = arith.constant 0.000000e+00 : f32
      %29 = vector.broadcast %cst_12 : f32 to vector<8x128xf32>
      %c0_13 = arith.constant 0 : index
      %c0_14 = arith.constant 0 : index
      %30 = vector.load %arg4[%c0_13, %c0_14] : memref<8x128xf32, #tpu.memory_space<vmem>>, vector<8x128xf32>
      tpu.vector_store %arg4[%c0_13, %c0_14], %29 {strides = array<i32>} : memref<8x128xf32, #tpu.memory_space<vmem>>, vector<8x128xf32>,
    } else {
    }
    %c0 = arith.constant 0 : index
    %c0_1 = arith.constant 0 : index
    %3 = vector.load %arg2[%c0, %c0_1] : memref<16x128xf32, #tpu.memory_space<vmem>>, vector<16x128xf32>
    %c1_i32 = arith.constant 1 : i32
    %4 = arith.muli %arg0, %c1_i32 : i32
    %5 = arith.addi %4, %arg1 : i32
    %c16_i32 = arith.constant 16 : i32
    %6 = arith.muli %5, %c16_i32 : i32
    %7 = tpu.iota {dimensions = array<i32: 0>} : vector<16x128xi32>
    %8 = vector.broadcast %6 : i32 to vector<16x128xi32>
    %9 = arith.addi %8, %7 : vector<16x128xi32>
    %cst = arith.constant 5.000000e-01 : f32
    %10 = vector.broadcast %cst : f32 to vector<16x128xf32>
    %11 = arith.cmpf ogt, %3, %10 : vector<16x128xf32>
    %cst_2 = arith.constant -5.000000e-01 : f32
    %12 = vector.broadcast %cst_2 : f32 to vector<16x128xf32>
    %13 = arith.cmpf olt, %3, %12 : vector<16x128xf32>
    %14 = arith.ori %11, %13 : vector<16x128xi1>
    %c16_i32_3 = arith.constant 16 : i32
    %15 = vector.broadcast %c16_i32_3 : i32 to vector<16x128xi32>
    %16 = arith.cmpi slt, %9, %15 : vector<16x128xi32>
    %17 = arith.andi %14, %16 : vector<16x128xi1>
    %cst_4 = arith.constant 0.000000e+00 : f32
    %18 = vector.broadcast %cst_4 : f32 to vector<16x128xf32>
    %19 = arith.select %17, %3, %18 : vector<16x128xi1>, vector<16x128xf32>
    %20 = arith.mulf %19, %19 : vector<16x128xf32>
    %c0_5 = arith.constant 0 : index
    %c0_6 = arith.constant 0 : index
    %21 = vector.load %arg4[%c0_5, %c0_6] : memref<8x128xf32, #tpu.memory_space<vmem>>, vector<8x128xf32>
    %22 = vector.shape_cast %20 : vector<16x128xf32> to vector<2x8x128xf32>
    %cst_7 = arith.constant dense<0.000000e+00> : vector<8x128xf32>
    %23 = vector.multi_reduction <add>, %22, %cst_7 [0] : vector<2x8x128xf32> to vector<8x128xf32>
    %24 = arith.addf %21, %23 : vector<8x128xf32>
    %c0_8 = arith.constant 0 : index
    %c0_9 = arith.constant 0 : index
    %25 = vector.load %arg4[%c0_8, %c0_9] : memref<8x128xf32, #tpu.memory_space<vmem>>, vector<8x128xf32>
    tpu.vector_store %arg4[%c0_8, %c0_9], %24 {strides = array<i32>} : memref<8x128xf32, #tpu.memory_space<vmem>>, vector<8x128xf32>,
    %c0_i32_10 = arith.constant 0 : i32
    %26 = arith.cmpi eq, %arg1, %c0_i32_10 : i32
    %27 = arith.extui %26 : i1 to i32
    %c0_i32_11 = arith.constant 0 : i32
    %28 = arith.cmpi ne, %27, %c0_i32_11 : i32
    scf.if %28 {
      %c0_12 = arith.constant 0 : index
      %c0_13 = arith.constant 0 : index
      %29 = vector.load %arg4[%c0_12, %c0_13] : memref<8x128xf32, #tpu.memory_space<vmem>>, vector<8x128xf32>
      %30 = vector.shape_cast %29 : vector<8x128xf32> to vector<1x8x128xf32>
      %cst_14 = arith.constant dense<0.000000e+00> : vector<1xf32>
      %31 = vector.multi_reduction <add>, %30, %cst_14 [1, 2] : vector<1x8x128xf32> to vector<1xf32>
      %32 = vector.shape_cast %31 : vector<1xf32> to vector<1x1x1xf32>
      %33 = vector.extract %32[0, 0, 0] : f32 from vector<1x1x1xf32>
      %c0_15 = arith.constant 0 : index
      %c0_16 = arith.constant 0 : index
      %34 = memref.load %arg3[%c0_15, %c0_16] : memref<1x1xf32, #tpu.memory_space<smem>>
      memref.store %33, %arg3[%c0_15, %c0_16] : memref<1x1xf32, #tpu.memory_space<smem>>
    } else {
    }
    return
  }
  func.func @transform_0(%arg0: i32, %arg1: i32) -> (i32, i32) {
    %c1_i32 = arith.constant 1 : i32
    %0 = arith.muli %arg0, %c1_i32 : i32
    %1 = arith.addi %0, %arg1 : i32
    %c0_i32 = arith.constant 0 : i32
    %c0_i32_0 = arith.constant 0 : i32
    return %1, %c0_i32 : i32, i32
  }
  func.func @transform_1(%arg0: i32, %arg1: i32) -> (i32, i32) {
    %c0_i32 = arith.constant 0 : i32
    %c0_i32_0 = arith.constant 0 : i32
    return %arg0, %c0_i32 : i32, i32
  }
}

</mosaic_0001>

<bundles_post_ra>
// kernel: tpu_custom_call.1
= control target key start
LH: loop header
LB: loop body
LE: loop exit
PB: predicated region body
PF: predicated region fallthrough
CT: control target
= control target key end

     0   :  { %6 = vsyncpa [#allocation4], 0  ;;  %s149_s0 = inlined_call_operand.hbm [shape: f32[16,128], index: 0, kind: input, shape index: {}]   ;;  %s150_s1 = inlined_call_operand.hbm [shape: f32[1,1], index: 1, kind: output, shape index: {}]  }
   0x1   :  { %7 = vsyncpa [#allocation5], 0  ;;  %s129_s6 = smov [#allocation3]  }
   0x2   :  { %s17_s7 = sshll.u32 %s129_s6, 4  ;;  %s18_s7 = int_to_ptr.vmem [resolvable:$true] %s17_s7 }
   0x3   :  { %s105_s8 = scalar_lea.vmem %s18_s7, 256  ;;  %p110_p1 = scmp.lt.s32.totalorder %s18_s7, %s18_s7 }
   0x4   :  { %p106_p0 = scmp.ne.s32.totalorder %s18_s7, %s105_s8  ;;  %p111_p2 = scmp.lt.s32.totalorder %s105_s8, %s105_s8 }
   0x6   :  { %p112_p3 = por %p111_p2, %p110_p1 }
   0x8   :  { %p113_p4 = pnand %p112_p3, %p106_p0 }
   0xa   :  { %116 = shalt.err (!%p113_p4)
}
   0xb   :  { %s130_s9 = smov 128   ;;  %s131_s10 = smov 8  }
   0xc   :  { %23 = dma.hbm_to_vmem [thread:$0]  %s149_s0, 256, %s18_s7, [#allocation4], %s130_s9, %s130_s9, %s131_s10  }
   0xd   :  { %125 = dma.done.wait [#allocation4], 256  }
   0xe   :  { %126 = vsyncadd [#allocation4], 4294967040  ;;  %v34_v0 = vld [vmem:[#allocation3] sm:$0xff]  ;;  %v35_v1 = vld [vmem:[#allocation3 + $0x8] sm:$0xff]  ;;  %s132_s13 = smov [#allocation6]  }
   0xf   :  { %vm44_vm0 = vcmp.gt.f32.partialorder %v34_v0, 0.5  ;;  %vm45_vm1 = vcmp.gt.f32.partialorder %v35_v1, 0.5  ;;  %vm46_vm2 = vcmp.lt.f32.partialorder %v34_v0, -0.5  ;;  %vm47_vm3 = vcmp.lt.f32.partialorder %v35_v1, -0.5 }
  0x10   :  { %vm48_vm4 = vmor %vm44_vm0, %vm46_vm2 }
  0x11   :  { %vm49_vm5 = vmor %vm45_vm1, %vm47_vm3  ;;  %v54_v2 = vsel %vm48_vm4, %v34_v0, 0.0 }
  0x12   :  { %v55_v3 = vsel %vm49_vm5, %v35_v1, 0.0  ;;  %v56_v4 = vmul.f32 %v54_v2, %v54_v2 }
  0x13   :  { %v57_v5 = vmul.f32 %v55_v3, %v55_v3 }
  0x15   :  { %v59_v6 = vadd.f32 %v57_v5, %v56_v4 }
  0x17   :  { %66 = vadd.xlane.f32.xlu0 %v59_v6 }
  0xa0   :  { %v67_v7 = vpop.xlane.xlu0 %66 }
  0xa1   :  { %v68_v8 = vrot.slane %v67_v7, 4 }
  0xa3   :  { %v69_v9 = vadd.f32 %v68_v8, %v67_v7 }
  0xa5   :  { %v70_v10 = vrot.slane %v69_v9, 2 }
  0xa7   :  { %v71_v11 = vadd.f32 %v70_v10, %v69_v9 }
  0xa9   :  { %v72_v12 = vrot.slane %v71_v11, 1 }
  0xab   :  { %v73_v13 = vadd.f32 %v72_v12, %v71_v11 }
  0xad   :  { %91 = vpush %v73_v13 }
  0xde   :  { %s92_s0 = spop %91 }
  0xdf   :  { %76 = sst [smem:[#allocation6]] %s92_s0 }
  0xe0   :  { %84 = dma.smem_to_hbm %s132_s13, 16, %s150_s1, [#allocation5]  }
  0xe1   :  { %127 = dma.done.wait [#allocation5], 16  }
  0xe2   :  { %128 = vsyncadd [#allocation5], 4294967280 }
  0xe3   :  { %88 = sfence }
  0xe4   :  { %89 = vsyncpa [#allocation4], 1 }
  0xe5   :  { %90 = vsyncpa [#allocation5], 1 }

</bundles_post_ra>
